<compile_context>
chip_gen: v5e
topology: v5e:2x2
jax: 0.10.0
libtpu: 0.0.40
codegen_flags: <defaults>
</compile_context>

<pallas_src>
import functools
import math

import jax
import jax.numpy as jnp
from jax.experimental import pallas as pl
from jax.experimental.pallas import tpu as pltpu


def _round_up(n, m):
    return ((n + m - 1) // m) * m


# ----------------------------- Pallas kernel ---------------------------------

def _fused_mlp_kernel(x_ref, w0_ref, b0_ref, wc_ref, bc_ref, wa_ref, ba_ref, out_ref,
                      *, p_cls, p_total, n_cls_rest, n_abn_rest):
    """Both DenseLayers fused into one kernel.

    x_ref  : (TB, F)                 f32 raw input tile (unpadded feature dim)
    w0_ref : (F, P_cls + P_abn)      fused layer-0 weights of both nets (f32 or bf16)
    b0_ref : (1, P_cls + P_abn)      fused layer-0 biases (f32)
    wc_ref : (Lc, P_cls, P_cls)      classification layers 1.. stacked
    bc_ref : (Lc, 1, P_cls)
    wa_ref : (La, P_abn, P_abn)      abnormal layers 1.. stacked
    ba_ref : (La, 1, P_abn)
    out_ref: (TB, P_cls + P_abn)     f32; cls logits in lanes [0:P_cls], abnormal in the rest
    """
    w_dtype = w0_ref.dtype

    # Fused layer 0: both networks consume the same x, so their first-layer weights are
    # concatenated along the output dim -> one wide MXU matmul, contraction depth = raw F.
    h0 = jnp.dot(x_ref[...].astype(w_dtype), w0_ref[...],
                 preferred_element_type=jnp.float32) + b0_ref[...]
    # Both DenseLayers apply ReLU after their first layer. Stage the activation in the
    # lane-dense output buffer so neither half is held live in vregs across the other chain.
    out_ref[...] = jnp.maximum(h0, 0.0)

    def run_rest(h, w_ref, b_ref, n_rest):
        # Remaining layers of one DenseLayer: ReLU on all but the last (static unroll —
        # depth is small; for very deep nets switch to lax.fori_loop(..., unroll=True)).
        for i in range(n_rest):
            h = jnp.dot(h.astype(w_dtype), w_ref[i],
                        preferred_element_type=jnp.float32) + b_ref[i]
            if i < n_rest - 1:
                h = jnp.maximum(h, 0.0)
        return h

    # Classification chain (reads its staged half; abnormal half stays parked in VMEM).
    out_ref[:, :p_cls] = run_rest(out_ref[:, :p_cls], wc_ref, bc_ref, n_cls_rest)
    # Abnormal chain.
    out_ref[:, p_cls:p_total] = run_rest(out_ref[:, p_cls:p_total], wa_ref, ba_ref, n_abn_rest)


# ------------------------------- wrapper --------------------------------------

@functools.partial(
    jax.jit,
    static_argnames=("n_cls_rest", "n_abn_rest", "p_cls", "p_abn",
                     "class_output_size", "input_size", "tile_b",
                     "single_buffer_weights"))
def fused_forward(x, w0, b0, wc, bc, wa, ba, *, n_cls_rest, n_abn_rest, p_cls, p_abn,
                  class_output_size, input_size, tile_b, single_buffer_weights):
    """Run both DenseLayers in a single pallas_call; returns (class_out, abnormal_out)."""
    B, F = x.shape
    p_total = p_cls + p_abn
    x = x.astype(jnp.float32)

    # Batch tile: multiple of 8, capped by tile_b; when the batch is big enough, also cap so
    # the grid has >= 2 steps (dimension_semantics=("parallel",) only helps with >= 2 steps).
    TB = min(_round_up(max(B, 8), 8), tile_b)
    if B >= 16:
        TB = min(TB, _round_up(-(-B // 2), 8))
    Bp = _round_up(B, TB)
    x_pad = x if Bp == B else jnp.pad(x, ((0, Bp - B), (0, 0)))

    kernel = functools.partial(_fused_mlp_kernel, p_cls=p_cls, p_total=p_total,
                               n_cls_rest=n_cls_rest, n_abn_rest=n_abn_rest)

    def rep_spec(shape):
        # Replicated (grid-invariant) operand: constant index_map; optionally single-buffered
        # (nothing to prefetch, so Buffered(1) halves its VMEM footprint at zero perf cost).
        nd = len(shape)
        kwargs = {}
        if single_buffer_weights:
            kwargs["pipeline_mode"] = pl.Buffered(1)
        return pl.BlockSpec(shape, lambda i: (0,) * nd, **kwargs)

    # Explicit VMEM budget: weight/bias stacks (x1 or x2 buffers) + double-buffered x / out
    # tiles + headroom for compiler scratch. Matters most on v7x (64 MiB physical VMEM) and
    # v5e (16 MiB scoped default).
    nbuf_w = 1 if single_buffer_weights else 2
    bytes_of = lambda a: a.size * a.dtype.itemsize
    weight_bytes = sum(bytes_of(a) for a in (w0, wc, wa, b0, bc, ba))
    io_bytes = 2 * (TB * F + TB * p_total) * 4
    vmem_limit = int(min(96 * (1 << 20), nbuf_w * weight_bytes + io_bytes + (16 << 20)))

    out_pad = pl.pallas_call(
        kernel,
        out_shape=jax.ShapeDtypeStruct((Bp, p_total), jnp.float32),
        grid_spec=pltpu.PrefetchScalarGridSpec(
            num_scalar_prefetch=0,
            grid=(Bp // TB,),
            in_specs=[
                pl.BlockSpec((TB, F), lambda i: (i, 0)),   # raw x tile (F == full last dim)
                rep_spec((F, p_total)),                    # fused layer-0 weight
                rep_spec((1, p_total)),                    # fused layer-0 bias
                rep_spec(wc.shape),                        # classification layers 1.. stacked
                rep_spec(bc.shape),
                rep_spec(wa.shape),                        # abnormal layers 1.. stacked
                rep_spec(ba.shape),
            ],
            out_specs=pl.BlockSpec((TB, p_total), lambda i: (i, 0)),  # merged, lane-dense
        ),
        compiler_params=pltpu.CompilerParams(
            dimension_semantics=("parallel",),
            vmem_limit_bytes=vmem_limit),
    )(x_pad, w0, b0, wc, bc, wa, ba)

    cls = out_pad[:B, :class_output_size]
    abn = out_pad[:B, p_cls:p_cls + input_size]
    return cls, abn


# --------------------------- parameter construction ---------------------------

def _init_dense_layer_params(key, input_size, output_size, hidden_size, num_layers, bias=True):
    """Init mirroring nn.Linear's U(-1/sqrt(fan_in), 1/sqrt(fan_in)); W stored as (in, out)."""
    dims = [(input_size, hidden_size)]
    for _ in range(num_layers):
        dims.append((hidden_size, hidden_size))
    dims.append((hidden_size, output_size))

    params = []
    for fan_in, fan_out in dims:
        key, kw, kb = jax.random.split(key, 3)
        bound = 1.0 / math.sqrt(fan_in)
        w = jax.random.uniform(kw, (fan_in, fan_out), jnp.float32, -bound, bound)
        if bias:
            b = jax.random.uniform(kb, (fan_out,), jnp.float32, -bound, bound)
        else:
            b = jnp.zeros((fan_out,), jnp.float32)
        params.append((w, b))
    return params


def _stack_rest(params, P, weight_dtype):
    """Zero-pad every (W, b) of layers 1.. to (P, P)/(1, P) and stack along a leading axis."""
    ws, bs = [], []
    for w, b in params:
        wp = jnp.zeros((P, P), jnp.float32).at[:w.shape[0], :w.shape[1]].set(w)
        bp = jnp.zeros((1, P), jnp.float32).at[0, :b.shape[0]].set(b)
        ws.append(wp)
        bs.append(bp)
    return jnp.stack(ws).astype(weight_dtype), jnp.stack(bs)   # biases stay f32


class DataClassificationPallas:
    def __init__(self, input_size, class_output_size, class_hidden_size, class_num_layers,
                 abnormal_hidden_size, abnormal_num_layers, bias=True, seed=0,
                 weight_dtype=jnp.bfloat16, tile_b=512):
        self.input_size = input_size
        self.class_output_size = class_output_size
        self.tile_b = tile_b
        self._single_buffer_weights = True

        # Per-network lane-dense padded widths (not a single global max).
        self.p_cls = _round_up(max(class_hidden_size, class_output_size, 128), 128)
        self.p_abn = _round_up(max(abnormal_hidden_size, input_size, 128), 128)
        p_total = self.p_cls + self.p_abn

        k1, k2 = jax.random.split(jax.random.PRNGKey(seed))
        self.classification_params = _init_dense_layer_params(
            k1, input_size, class_output_size, class_hidden_size, class_num_layers, bias)
        self.abnormal_params = _init_dense_layer_params(
            k2, input_size, input_size, abnormal_hidden_size, abnormal_num_layers, bias)

        self.n_cls_rest = len(self.classification_params) - 1
        self.n_abn_rest = len(self.abnormal_params) - 1

        # Fused layer 0 (both nets consume x): (F, P_cls + P_abn) — no row padding of F.
        w0c, b0c = self.classification_params[0]
        w0a, b0a = self.abnormal_params[0]
        w0 = jnp.zeros((input_size, p_total), jnp.float32)
        w0 = w0.at[:, :w0c.shape[1]].set(w0c)
        w0 = w0.at[:, self.p_cls:self.p_cls + w0a.shape[1]].set(w0a)
        b0 = jnp.zeros((1, p_total), jnp.float32)
        b0 = b0.at[0, :b0c.shape[0]].set(b0c)
        b0 = b0.at[0, self.p_cls:self.p_cls + b0a.shape[0]].set(b0a)
        self.w0 = w0.astype(weight_dtype)
        self.b0 = b0

        # Remaining layers of each network, stacked at that network's padded width.
        self.wc, self.bc = _stack_rest(self.classification_params[1:], self.p_cls, weight_dtype)
        self.wa, self.ba = _stack_rest(self.abnormal_params[1:], self.p_abn, weight_dtype)

    def _forward(self, x, single_buffer_weights):
        return fused_forward(
            x, self.w0, self.b0, self.wc, self.bc, self.wa, self.ba,
            n_cls_rest=self.n_cls_rest, n_abn_rest=self.n_abn_rest,
            p_cls=self.p_cls, p_abn=self.p_abn,
            class_output_size=self.class_output_size, input_size=self.input_size,
            tile_b=self.tile_b, single_buffer_weights=single_buffer_weights)

    def __call__(self, x):
        if self._single_buffer_weights:
            try:
                return self._forward(x, True)
            except Exception:
                # pl.Buffered(1) single-buffering unavailable on this JAX build; use default.
                self._single_buffer_weights = False
        return self._forward(x, False)


# ------------------------------- reference ------------------------------------

def _reference_forward(x, params):
    h = x
    for i, (w, b) in enumerate(params):
        h = h @ w + b
        if i < len(params) - 1:
            h = jnp.maximum(h, 0.0)
    return h


# ----------------------------------- main -------------------------------------

if __name__ == "__main__":
    # Small shapes consistent with the module's forward: x is (batch, input_size).
    batch = 8
    input_size = 32
    class_output_size = 4
    class_hidden_size = 32
    class_num_layers = 2
    abnormal_hidden_size = 32
    abnormal_num_layers = 1

    x = jax.random.normal(jax.random.PRNGKey(0), (batch, input_size), jnp.float32)

    # f32 model: strict numeric check against a plain-JAX reference of the same math.
    model = DataClassificationPallas(
        input_size, class_output_size, class_hidden_size, class_num_layers,
        abnormal_hidden_size, abnormal_num_layers, bias=True, seed=0,
        weight_dtype=jnp.float32)
    x1, x2 = model(x)
    jax.block_until_ready((x1, x2))

    ref1 = _reference_forward(x, model.classification_params)
    ref2 = _reference_forward(x, model.abnormal_params)
    assert x1.shape == (batch, class_output_size)
    assert x2.shape == (batch, input_size)
    assert jnp.allclose(x1, ref1, atol=1e-5, rtol=1e-5)
    assert jnp.allclose(x2, ref2, atol=1e-5, rtol=1e-5)

    # Non-multiple batch: exercises batch padding and the >=2-step grid path.
    x_big = jax.random.normal(jax.random.PRNGKey(1), (37, input_size), jnp.float32)
    y1, y2 = model(x_big)
    jax.block_until_ready((y1, y2))
    assert y1.shape == (37, class_output_size) and y2.shape == (37, input_size)
    assert jnp.allclose(y1, _reference_forward(x_big, model.classification_params),
                        atol=1e-4, rtol=1e-4)
    assert jnp.allclose(y2, _reference_forward(x_big, model.abnormal_params),
                        atol=1e-4, rtol=1e-4)

    # Default (bf16-weight) model: MXU bf16 path with f32 accumulation; loose check.
    model_bf16 = DataClassificationPallas(
        input_size, class_output_size, class_hidden_size, class_num_layers,
        abnormal_hidden_size, abnormal_num_layers, bias=True, seed=0)
    z1, z2 = model_bf16(x)
    jax.block_until_ready((z1, z2))
    assert z1.shape == (batch, class_output_size)
    assert z2.shape == (batch, input_size)
    assert bool(jnp.all(jnp.isfinite(z1))) and bool(jnp.all(jnp.isfinite(z2)))
    assert jnp.allclose(z1, ref1, atol=2e-1, rtol=2e-1)
    assert jnp.allclose(z2, ref2, atol=2e-1, rtol=2e-1)

    print("KERNEL_OK")
</pallas_src>

<mosaic_0001>
module attributes {stable_mosaic.version = 11 : i64} {
  func.func @_fused_mlp_kernel(%arg0: i32, %arg1: memref<8x32xf32, #tpu.memory_space<vmem>>, %arg2: memref<32x256xf32, #tpu.memory_space<vmem>>, %arg3: memref<1x256xf32, #tpu.memory_space<vmem>>, %arg4: memref<3x128x128xf32, #tpu.memory_space<vmem>>, %arg5: memref<3x1x128xf32, #tpu.memory_space<vmem>>, %arg6: memref<2x128x128xf32, #tpu.memory_space<vmem>>, %arg7: memref<2x1x128xf32, #tpu.memory_space<vmem>>, %arg8: memref<8x256xf32, #tpu.memory_space<vmem>>) attributes {dimension_semantics = [#tpu.dimension_semantics<parallel>], iteration_bounds = array<i64: 1>, scalar_prefetch = 0 : i64, scratch_operands = 0 : i64, tpu.core_type = #tpu.core_type<tc>, window_params = [{transform_indices = @transform_0, window_bounds = array<i64: 8, 32>}, {pipeline_mode = #tpu.pipeline_mode<synchronous>, transform_indices = @transform_1, window_bounds = array<i64: 32, 256>}, {pipeline_mode = #tpu.pipeline_mode<synchronous>, transform_indices = @transform_2, window_bounds = array<i64: 1, 256>}, {pipeline_mode = #tpu.pipeline_mode<synchronous>, transform_indices = @transform_3, window_bounds = array<i64: 3, 128, 128>}, {pipeline_mode = #tpu.pipeline_mode<synchronous>, transform_indices = @transform_4, window_bounds = array<i64: 3, 1, 128>}, {pipeline_mode = #tpu.pipeline_mode<synchronous>, transform_indices = @transform_5, window_bounds = array<i64: 2, 128, 128>}, {pipeline_mode = #tpu.pipeline_mode<synchronous>, transform_indices = @transform_6, window_bounds = array<i64: 2, 1, 128>}, {transform_indices = @transform_7, window_bounds = array<i64: 8, 256>}]} {
    %c0 = arith.constant 0 : index
    %c0_0 = arith.constant 0 : index
    %0 = vector.load %arg1[%c0, %c0_0] : memref<8x32xf32, #tpu.memory_space<vmem>>, vector<8x32xf32>
    %c0_1 = arith.constant 0 : index
    %c0_2 = arith.constant 0 : index
    %1 = vector.load %arg2[%c0_1, %c0_2] : memref<32x256xf32, #tpu.memory_space<vmem>>, vector<32x256xf32>
    %cst = arith.constant dense<0.000000e+00> : vector<8x256xf32>
    %2 = tpu.matmul %0, %1, %cst {dimension_numbers = #tpu.dot_dimension_numbers<[1], [0], [0], [1], [0, 0, 1, 1], [], []>} : vector<8x32xf32>, vector<32x256xf32>, vector<8x256xf32> -> vector<8x256xf32>
    %c0_3 = arith.constant 0 : index
    %c0_4 = arith.constant 0 : index
    %3 = vector.load %arg3[%c0_3, %c0_4] : memref<1x256xf32, #tpu.memory_space<vmem>>, vector<1x256xf32>
    %4 = vector.broadcast %3 : vector<1x256xf32> to vector<8x256xf32>
    %5 = arith.addf %2, %4 : vector<8x256xf32>
    %cst_5 = arith.constant 0.000000e+00 : f32
    %6 = vector.broadcast %cst_5 : f32 to vector<8x256xf32>
    %7 = arith.maximumf %5, %6 : vector<8x256xf32>
    %c0_6 = arith.constant 0 : index
    %c0_7 = arith.constant 0 : index
    %8 = vector.load %arg8[%c0_6, %c0_7] : memref<8x256xf32, #tpu.memory_space<vmem>>, vector<8x256xf32>
    tpu.vector_store %arg8[%c0_6, %c0_7], %7 {strides = array<i32>} : memref<8x256xf32, #tpu.memory_space<vmem>>, vector<8x256xf32>,
    %c0_8 = arith.constant 0 : index
    %c0_9 = arith.constant 0 : index
    %9 = vector.load %arg8[%c0_8, %c0_9] : memref<8x256xf32, #tpu.memory_space<vmem>>, vector<8x128xf32>
    %c0_10 = arith.constant 0 : index
    %c0_11 = arith.constant 0 : index
    %c0_12 = arith.constant 0 : index
    %10 = vector.load %arg4[%c0_10, %c0_11, %c0_12] : memref<3x128x128xf32, #tpu.memory_space<vmem>>, vector<1x128x128xf32>
    %11 = vector.shape_cast %10 : vector<1x128x128xf32> to vector<128x128xf32>
    %cst_13 = arith.constant dense<0.000000e+00> : vector<8x128xf32>
    %12 = tpu.matmul %9, %11, %cst_13 {dimension_numbers = #tpu.dot_dimension_numbers<[1], [0], [0], [1], [0, 0, 1, 1], [], []>} : vector<8x128xf32>, vector<128x128xf32>, vector<8x128xf32> -> vector<8x128xf32>
    %c0_14 = arith.constant 0 : index
    %c0_15 = arith.constant 0 : index
    %c0_16 = arith.constant 0 : index
    %13 = vector.load %arg5[%c0_14, %c0_15, %c0_16] : memref<3x1x128xf32, #tpu.memory_space<vmem>>, vector<1x1x128xf32>
    %14 = vector.shape_cast %13 : vector<1x1x128xf32> to vector<1x128xf32>
    %15 = vector.broadcast %14 : vector<1x128xf32> to vector<8x128xf32>
    %16 = arith.addf %12, %15 : vector<8x128xf32>
    %cst_17 = arith.constant 0.000000e+00 : f32
    %17 = vector.broadcast %cst_17 : f32 to vector<8x128xf32>
    %18 = arith.maximumf %16, %17 : vector<8x128xf32>
    %c1 = arith.constant 1 : index
    %c0_18 = arith.constant 0 : index
    %c0_19 = arith.constant 0 : index
    %19 = vector.load %arg4[%c1, %c0_18, %c0_19] : memref<3x128x128xf32, #tpu.memory_space<vmem>>, vector<1x128x128xf32>
    %20 = vector.shape_cast %19 : vector<1x128x128xf32> to vector<128x128xf32>
    %cst_20 = arith.constant dense<0.000000e+00> : vector<8x128xf32>
    %21 = tpu.matmul %18, %20, %cst_20 {dimension_numbers = #tpu.dot_dimension_numbers<[1], [0], [0], [1], [0, 0, 1, 1], [], []>} : vector<8x128xf32>, vector<128x128xf32>, vector<8x128xf32> -> vector<8x128xf32>
    %c1_21 = arith.constant 1 : index
    %c0_22 = arith.constant 0 : index
    %c0_23 = arith.constant 0 : index
    %22 = vector.load %arg5[%c1_21, %c0_22, %c0_23] : memref<3x1x128xf32, #tpu.memory_space<vmem>>, vector<1x1x128xf32>
    %23 = vector.shape_cast %22 : vector<1x1x128xf32> to vector<1x128xf32>
    %24 = vector.broadcast %23 : vector<1x128xf32> to vector<8x128xf32>
    %25 = arith.addf %21, %24 : vector<8x128xf32>
    %cst_24 = arith.constant 0.000000e+00 : f32
    %26 = vector.broadcast %cst_24 : f32 to vector<8x128xf32>
    %27 = arith.maximumf %25, %26 : vector<8x128xf32>
    %c2 = arith.constant 2 : index
    %c0_25 = arith.constant 0 : index
    %c0_26 = arith.constant 0 : index
    %28 = vector.load %arg4[%c2, %c0_25, %c0_26] : memref<3x128x128xf32, #tpu.memory_space<vmem>>, vector<1x128x128xf32>
    %29 = vector.shape_cast %28 : vector<1x128x128xf32> to vector<128x128xf32>
    %cst_27 = arith.constant dense<0.000000e+00> : vector<8x128xf32>
    %30 = tpu.matmul %27, %29, %cst_27 {dimension_numbers = #tpu.dot_dimension_numbers<[1], [0], [0], [1], [0, 0, 1, 1], [], []>} : vector<8x128xf32>, vector<128x128xf32>, vector<8x128xf32> -> vector<8x128xf32>
    %c2_28 = arith.constant 2 : index
    %c0_29 = arith.constant 0 : index
    %c0_30 = arith.constant 0 : index
    %31 = vector.load %arg5[%c2_28, %c0_29, %c0_30] : memref<3x1x128xf32, #tpu.memory_space<vmem>>, vector<1x1x128xf32>
    %32 = vector.shape_cast %31 : vector<1x1x128xf32> to vector<1x128xf32>
    %33 = vector.broadcast %32 : vector<1x128xf32> to vector<8x128xf32>
    %34 = arith.addf %30, %33 : vector<8x128xf32>
    %c0_31 = arith.constant 0 : index
    %c0_32 = arith.constant 0 : index
    %35 = vector.load %arg8[%c0_31, %c0_32] : memref<8x256xf32, #tpu.memory_space<vmem>>, vector<8x128xf32>
    tpu.vector_store %arg8[%c0_31, %c0_32], %34 {strides = array<i32>} : memref<8x256xf32, #tpu.memory_space<vmem>>, vector<8x128xf32>,
    %c0_33 = arith.constant 0 : index
    %c128 = arith.constant 128 : index
    %36 = vector.load %arg8[%c0_33, %c128] : memref<8x256xf32, #tpu.memory_space<vmem>>, vector<8x128xf32>
    %c0_34 = arith.constant 0 : index
    %c0_35 = arith.constant 0 : index
    %c0_36 = arith.constant 0 : index
    %37 = vector.load %arg6[%c0_34, %c0_35, %c0_36] : memref<2x128x128xf32, #tpu.memory_space<vmem>>, vector<1x128x128xf32>
    %38 = vector.shape_cast %37 : vector<1x128x128xf32> to vector<128x128xf32>
    %cst_37 = arith.constant dense<0.000000e+00> : vector<8x128xf32>
    %39 = tpu.matmul %36, %38, %cst_37 {dimension_numbers = #tpu.dot_dimension_numbers<[1], [0], [0], [1], [0, 0, 1, 1], [], []>} : vector<8x128xf32>, vector<128x128xf32>, vector<8x128xf32> -> vector<8x128xf32>
    %c0_38 = arith.constant 0 : index
    %c0_39 = arith.constant 0 : index
    %c0_40 = arith.constant 0 : index
    %40 = vector.load %arg7[%c0_38, %c0_39, %c0_40] : memref<2x1x128xf32, #tpu.memory_space<vmem>>, vector<1x1x128xf32>
    %41 = vector.shape_cast %40 : vector<1x1x128xf32> to vector<1x128xf32>
    %42 = vector.broadcast %41 : vector<1x128xf32> to vector<8x128xf32>
    %43 = arith.addf %39, %42 : vector<8x128xf32>
    %cst_41 = arith.constant 0.000000e+00 : f32
    %44 = vector.broadcast %cst_41 : f32 to vector<8x128xf32>
    %45 = arith.maximumf %43, %44 : vector<8x128xf32>
    %c1_42 = arith.constant 1 : index
    %c0_43 = arith.constant 0 : index
    %c0_44 = arith.constant 0 : index
    %46 = vector.load %arg6[%c1_42, %c0_43, %c0_44] : memref<2x128x128xf32, #tpu.memory_space<vmem>>, vector<1x128x128xf32>
    %47 = vector.shape_cast %46 : vector<1x128x128xf32> to vector<128x128xf32>
    %cst_45 = arith.constant dense<0.000000e+00> : vector<8x128xf32>
    %48 = tpu.matmul %45, %47, %cst_45 {dimension_numbers = #tpu.dot_dimension_numbers<[1], [0], [0], [1], [0, 0, 1, 1], [], []>} : vector<8x128xf32>, vector<128x128xf32>, vector<8x128xf32> -> vector<8x128xf32>
    %c1_46 = arith.constant 1 : index
    %c0_47 = arith.constant 0 : index
    %c0_48 = arith.constant 0 : index
    %49 = vector.load %arg7[%c1_46, %c0_47, %c0_48] : memref<2x1x128xf32, #tpu.memory_space<vmem>>, vector<1x1x128xf32>
    %50 = vector.shape_cast %49 : vector<1x1x128xf32> to vector<1x128xf32>
    %51 = vector.broadcast %50 : vector<1x128xf32> to vector<8x128xf32>
    %52 = arith.addf %48, %51 : vector<8x128xf32>
    %c0_49 = arith.constant 0 : index
    %c128_50 = arith.constant 128 : index
    %53 = vector.load %arg8[%c0_49, %c128_50] : memref<8x256xf32, #tpu.memory_space<vmem>>, vector<8x128xf32>
    tpu.vector_store %arg8[%c0_49, %c128_50], %52 {strides = array<i32>} : memref<8x256xf32, #tpu.memory_space<vmem>>, vector<8x128xf32>,
    return
  }
  func.func @transform_0(%arg0: i32) -> (i32, i32) {
    %c0_i32 = arith.constant 0 : i32
    %c0_i32_0 = arith.constant 0 : i32
    return %arg0, %c0_i32 : i32, i32
  }
  func.func @transform_1(%arg0: i32) -> (i32, i32) {
    %c0_i32 = arith.constant 0 : i32
    %c0_i32_0 = arith.constant 0 : i32
    %c0_i32_1 = arith.constant 0 : i32
    return %c0_i32, %c0_i32_0 : i32, i32
  }
  func.func @transform_2(%arg0: i32) -> (i32, i32) {
    %c0_i32 = arith.constant 0 : i32
    %c0_i32_0 = arith.constant 0 : i32
    %c0_i32_1 = arith.constant 0 : i32
    return %c0_i32, %c0_i32_0 : i32, i32
  }
  func.func @transform_3(%arg0: i32) -> (i32, i32, i32) {
    %c0_i32 = arith.constant 0 : i32
    %c0_i32_0 = arith.constant 0 : i32
    %c0_i32_1 = arith.constant 0 : i32
    %c0_i32_2 = arith.constant 0 : i32
    return %c0_i32, %c0_i32_0, %c0_i32_1 : i32, i32, i32
  }
  func.func @transform_4(%arg0: i32) -> (i32, i32, i32) {
    %c0_i32 = arith.constant 0 : i32
    %c0_i32_0 = arith.constant 0 : i32
    %c0_i32_1 = arith.constant 0 : i32
    %c0_i32_2 = arith.constant 0 : i32
    return %c0_i32, %c0_i32_0, %c0_i32_1 : i32, i32, i32
  }
  func.func @transform_5(%arg0: i32) -> (i32, i32, i32) {
    %c0_i32 = arith.constant 0 : i32
    %c0_i32_0 = arith.constant 0 : i32
    %c0_i32_1 = arith.constant 0 : i32
    %c0_i32_2 = arith.constant 0 : i32
    return %c0_i32, %c0_i32_0, %c0_i32_1 : i32, i32, i32
  }
  func.func @transform_6(%arg0: i32) -> (i32, i32, i32) {
    %c0_i32 = arith.constant 0 : i32
    %c0_i32_0 = arith.constant 0 : i32
    %c0_i32_1 = arith.constant 0 : i32
    %c0_i32_2 = arith.constant 0 : i32
    return %c0_i32, %c0_i32_0, %c0_i32_1 : i32, i32, i32
  }
  func.func @transform_7(%arg0: i32) -> (i32, i32) {
    %c0_i32 = arith.constant 0 : i32
    %c0_i32_0 = arith.constant 0 : i32
    return %arg0, %c0_i32 : i32, i32
  }
}

module attributes {stable_mosaic.version = 11 : i64} {
  func.func @_fused_mlp_kernel(%arg0: i32, %arg1: memref<8x32xf32, #tpu.memory_space<vmem>>, %arg2: memref<32x256xf32, #tpu.memory_space<vmem>>, %arg3: memref<1x256xf32, #tpu.memory_space<vmem>>, %arg4: memref<3x128x128xf32, #tpu.memory_space<vmem>>, %arg5: memref<3x1x128xf32, #tpu.memory_space<vmem>>, %arg6: memref<2x128x128xf32, #tpu.memory_space<vmem>>, %arg7: memref<2x1x128xf32, #tpu.memory_space<vmem>>, %arg8: memref<8x256xf32, #tpu.memory_space<vmem>>) attributes {dimension_semantics = [#tpu.dimension_semantics<parallel>], iteration_bounds = array<i64: 1>, scalar_prefetch = 0 : i64, scratch_operands = 0 : i64, tpu.core_type = #tpu.core_type<tc>, window_params = [{transform_indices = @transform_0, window_bounds = array<i64: 8, 32>}, {pipeline_mode = #tpu.pipeline_mode<synchronous>, transform_indices = @transform_1, window_bounds = array<i64: 32, 256>}, {pipeline_mode = #tpu.pipeline_mode<synchronous>, transform_indices = @transform_2, window_bounds = array<i64: 1, 256>}, {pipeline_mode = #tpu.pipeline_mode<synchronous>, transform_indices = @transform_3, window_bounds = array<i64: 3, 128, 128>}, {pipeline_mode = #tpu.pipeline_mode<synchronous>, transform_indices = @transform_4, window_bounds = array<i64: 3, 1, 128>}, {pipeline_mode = #tpu.pipeline_mode<synchronous>, transform_indices = @transform_5, window_bounds = array<i64: 2, 128, 128>}, {pipeline_mode = #tpu.pipeline_mode<synchronous>, transform_indices = @transform_6, window_bounds = array<i64: 2, 1, 128>}, {transform_indices = @transform_7, window_bounds = array<i64: 8, 256>}]} {
    %c0 = arith.constant 0 : index
    %c0_0 = arith.constant 0 : index
    %0 = vector.load %arg1[%c0, %c0_0] : memref<8x32xf32, #tpu.memory_space<vmem>>, vector<8x32xf32>
    %c0_1 = arith.constant 0 : index
    %c0_2 = arith.constant 0 : index
    %1 = vector.load %arg2[%c0_1, %c0_2] : memref<32x256xf32, #tpu.memory_space<vmem>>, vector<32x256xf32>
    %cst = arith.constant dense<0.000000e+00> : vector<8x256xf32>
    %2 = tpu.matmul %0, %1, %cst {dimension_numbers = #tpu.dot_dimension_numbers<[1], [0], [0], [1], [0, 0, 1, 1], [], []>} : vector<8x32xf32>, vector<32x256xf32>, vector<8x256xf32> -> vector<8x256xf32>
    %c0_3 = arith.constant 0 : index
    %c0_4 = arith.constant 0 : index
    %3 = vector.load %arg3[%c0_3, %c0_4] : memref<1x256xf32, #tpu.memory_space<vmem>>, vector<1x256xf32>
    %4 = vector.broadcast %3 : vector<1x256xf32> to vector<8x256xf32>
    %5 = arith.addf %2, %4 : vector<8x256xf32>
    %cst_5 = arith.constant 0.000000e+00 : f32
    %6 = vector.broadcast %cst_5 : f32 to vector<8x256xf32>
    %7 = arith.maximumf %5, %6 : vector<8x256xf32>
    %c0_6 = arith.constant 0 : index
    %c0_7 = arith.constant 0 : index
    %8 = vector.load %arg8[%c0_6, %c0_7] : memref<8x256xf32, #tpu.memory_space<vmem>>, vector<8x256xf32>
    tpu.vector_store %arg8[%c0_6, %c0_7], %7 {strides = array<i32>} : memref<8x256xf32, #tpu.memory_space<vmem>>, vector<8x256xf32>,
    %c0_8 = arith.constant 0 : index
    %c0_9 = arith.constant 0 : index
    %9 = vector.load %arg8[%c0_8, %c0_9] : memref<8x256xf32, #tpu.memory_space<vmem>>, vector<8x128xf32>
    %c0_10 = arith.constant 0 : index
    %c0_11 = arith.constant 0 : index
    %c0_12 = arith.constant 0 : index
    %10 = vector.load %arg4[%c0_10, %c0_11, %c0_12] : memref<3x128x128xf32, #tpu.memory_space<vmem>>, vector<1x128x128xf32>
    %11 = vector.shape_cast %10 : vector<1x128x128xf32> to vector<128x128xf32>
    %cst_13 = arith.constant dense<0.000000e+00> : vector<8x128xf32>
    %12 = tpu.matmul %9, %11, %cst_13 {dimension_numbers = #tpu.dot_dimension_numbers<[1], [0], [0], [1], [0, 0, 1, 1], [], []>} : vector<8x128xf32>, vector<128x128xf32>, vector<8x128xf32> -> vector<8x128xf32>
    %c0_14 = arith.constant 0 : index
    %c0_15 = arith.constant 0 : index
    %c0_16 = arith.constant 0 : index
    %13 = vector.load %arg5[%c0_14, %c0_15, %c0_16] : memref<3x1x128xf32, #tpu.memory_space<vmem>>, vector<1x1x128xf32>
    %14 = vector.shape_cast %13 : vector<1x1x128xf32> to vector<1x128xf32>
    %15 = vector.broadcast %14 : vector<1x128xf32> to vector<8x128xf32>
    %16 = arith.addf %12, %15 : vector<8x128xf32>
    %cst_17 = arith.constant 0.000000e+00 : f32
    %17 = vector.broadcast %cst_17 : f32 to vector<8x128xf32>
    %18 = arith.maximumf %16, %17 : vector<8x128xf32>
    %c1 = arith.constant 1 : index
    %c0_18 = arith.constant 0 : index
    %c0_19 = arith.constant 0 : index
    %19 = vector.load %arg4[%c1, %c0_18, %c0_19] : memref<3x128x128xf32, #tpu.memory_space<vmem>>, vector<1x128x128xf32>
    %20 = vector.shape_cast %19 : vector<1x128x128xf32> to vector<128x128xf32>
    %cst_20 = arith.constant dense<0.000000e+00> : vector<8x128xf32>
    %21 = tpu.matmul %18, %20, %cst_20 {dimension_numbers = #tpu.dot_dimension_numbers<[1], [0], [0], [1], [0, 0, 1, 1], [], []>} : vector<8x128xf32>, vector<128x128xf32>, vector<8x128xf32> -> vector<8x128xf32>
    %c1_21 = arith.constant 1 : index
    %c0_22 = arith.constant 0 : index
    %c0_23 = arith.constant 0 : index
    %22 = vector.load %arg5[%c1_21, %c0_22, %c0_23] : memref<3x1x128xf32, #tpu.memory_space<vmem>>, vector<1x1x128xf32>
    %23 = vector.shape_cast %22 : vector<1x1x128xf32> to vector<1x128xf32>
    %24 = vector.broadcast %23 : vector<1x128xf32> to vector<8x128xf32>
    %25 = arith.addf %21, %24 : vector<8x128xf32>
    %cst_24 = arith.constant 0.000000e+00 : f32
    %26 = vector.broadcast %cst_24 : f32 to vector<8x128xf32>
    %27 = arith.maximumf %25, %26 : vector<8x128xf32>
    %c2 = arith.constant 2 : index
    %c0_25 = arith.constant 0 : index
    %c0_26 = arith.constant 0 : index
    %28 = vector.load %arg4[%c2, %c0_25, %c0_26] : memref<3x128x128xf32, #tpu.memory_space<vmem>>, vector<1x128x128xf32>
    %29 = vector.shape_cast %28 : vector<1x128x128xf32> to vector<128x128xf32>
    %cst_27 = arith.constant dense<0.000000e+00> : vector<8x128xf32>
    %30 = tpu.matmul %27, %29, %cst_27 {dimension_numbers = #tpu.dot_dimension_numbers<[1], [0], [0], [1], [0, 0, 1, 1], [], []>} : vector<8x128xf32>, vector<128x128xf32>, vector<8x128xf32> -> vector<8x128xf32>
    %c2_28 = arith.constant 2 : index
    %c0_29 = arith.constant 0 : index
    %c0_30 = arith.constant 0 : index
    %31 = vector.load %arg5[%c2_28, %c0_29, %c0_30] : memref<3x1x128xf32, #tpu.memory_space<vmem>>, vector<1x1x128xf32>
    %32 = vector.shape_cast %31 : vector<1x1x128xf32> to vector<1x128xf32>
    %33 = vector.broadcast %32 : vector<1x128xf32> to vector<8x128xf32>
    %34 = arith.addf %30, %33 : vector<8x128xf32>
    %c0_31 = arith.constant 0 : index
    %c0_32 = arith.constant 0 : index
    %35 = vector.load %arg8[%c0_31, %c0_32] : memref<8x256xf32, #tpu.memory_space<vmem>>, vector<8x128xf32>
    tpu.vector_store %arg8[%c0_31, %c0_32], %34 {strides = array<i32>} : memref<8x256xf32, #tpu.memory_space<vmem>>, vector<8x128xf32>,
    %c0_33 = arith.constant 0 : index
    %c128 = arith.constant 128 : index
    %36 = vector.load %arg8[%c0_33, %c128] : memref<8x256xf32, #tpu.memory_space<vmem>>, vector<8x128xf32>
    %c0_34 = arith.constant 0 : index
    %c0_35 = arith.constant 0 : index
    %c0_36 = arith.constant 0 : index
    %37 = vector.load %arg6[%c0_34, %c0_35, %c0_36] : memref<2x128x128xf32, #tpu.memory_space<vmem>>, vector<1x128x128xf32>
    %38 = vector.shape_cast %37 : vector<1x128x128xf32> to vector<128x128xf32>
    %cst_37 = arith.constant dense<0.000000e+00> : vector<8x128xf32>
    %39 = tpu.matmul %36, %38, %cst_37 {dimension_numbers = #tpu.dot_dimension_numbers<[1], [0], [0], [1], [0, 0, 1, 1], [], []>} : vector<8x128xf32>, vector<128x128xf32>, vector<8x128xf32> -> vector<8x128xf32>
    %c0_38 = arith.constant 0 : index
    %c0_39 = arith.constant 0 : index
    %c0_40 = arith.constant 0 : index
    %40 = vector.load %arg7[%c0_38, %c0_39, %c0_40] : memref<2x1x128xf32, #tpu.memory_space<vmem>>, vector<1x1x128xf32>
    %41 = vector.shape_cast %40 : vector<1x1x128xf32> to vector<1x128xf32>
    %42 = vector.broadcast %41 : vector<1x128xf32> to vector<8x128xf32>
    %43 = arith.addf %39, %42 : vector<8x128xf32>
    %cst_41 = arith.constant 0.000000e+00 : f32
    %44 = vector.broadcast %cst_41 : f32 to vector<8x128xf32>
    %45 = arith.maximumf %43, %44 : vector<8x128xf32>
    %c1_42 = arith.constant 1 : index
    %c0_43 = arith.constant 0 : index
    %c0_44 = arith.constant 0 : index
    %46 = vector.load %arg6[%c1_42, %c0_43, %c0_44] : memref<2x128x128xf32, #tpu.memory_space<vmem>>, vector<1x128x128xf32>
    %47 = vector.shape_cast %46 : vector<1x128x128xf32> to vector<128x128xf32>
    %cst_45 = arith.constant dense<0.000000e+00> : vector<8x128xf32>
    %48 = tpu.matmul %45, %47, %cst_45 {dimension_numbers = #tpu.dot_dimension_numbers<[1], [0], [0], [1], [0, 0, 1, 1], [], []>} : vector<8x128xf32>, vector<128x128xf32>, vector<8x128xf32> -> vector<8x128xf32>
    %c1_46 = arith.constant 1 : index
    %c0_47 = arith.constant 0 : index
    %c0_48 = arith.constant 0 : index
    %49 = vector.load %arg7[%c1_46, %c0_47, %c0_48] : memref<2x1x128xf32, #tpu.memory_space<vmem>>, vector<1x1x128xf32>
    %50 = vector.shape_cast %49 : vector<1x1x128xf32> to vector<1x128xf32>
    %51 = vector.broadcast %50 : vector<1x128xf32> to vector<8x128xf32>
    %52 = arith.addf %48, %51 : vector<8x128xf32>
    %c0_49 = arith.constant 0 : index
    %c128_50 = arith.constant 128 : index
    %53 = vector.load %arg8[%c0_49, %c128_50] : memref<8x256xf32, #tpu.memory_space<vmem>>, vector<8x128xf32>
    tpu.vector_store %arg8[%c0_49, %c128_50], %52 {strides = array<i32>} : memref<8x256xf32, #tpu.memory_space<vmem>>, vector<8x128xf32>,
    return
  }
  func.func @transform_0(%arg0: i32) -> (i32, i32) {
    %c0_i32 = arith.constant 0 : i32
    %c0_i32_0 = arith.constant 0 : i32
    return %arg0, %c0_i32 : i32, i32
  }
  func.func @transform_1(%arg0: i32) -> (i32, i32) {
    %c0_i32 = arith.constant 0 : i32
    %c0_i32_0 = arith.constant 0 : i32
    %c0_i32_1 = arith.constant 0 : i32
    return %c0_i32, %c0_i32_0 : i32, i32
  }
  func.func @transform_2(%arg0: i32) -> (i32, i32) {
    %c0_i32 = arith.constant 0 : i32
    %c0_i32_0 = arith.constant 0 : i32
    %c0_i32_1 = arith.constant 0 : i32
    return %c0_i32, %c0_i32_0 : i32, i32
  }
  func.func @transform_3(%arg0: i32) -> (i32, i32, i32) {
    %c0_i32 = arith.constant 0 : i32
    %c0_i32_0 = arith.constant 0 : i32
    %c0_i32_1 = arith.constant 0 : i32
    %c0_i32_2 = arith.constant 0 : i32
    return %c0_i32, %c0_i32_0, %c0_i32_1 : i32, i32, i32
  }
  func.func @transform_4(%arg0: i32) -> (i32, i32, i32) {
    %c0_i32 = arith.constant 0 : i32
    %c0_i32_0 = arith.constant 0 : i32
    %c0_i32_1 = arith.constant 0 : i32
    %c0_i32_2 = arith.constant 0 : i32
    return %c0_i32, %c0_i32_0, %c0_i32_1 : i32, i32, i32
  }
  func.func @transform_5(%arg0: i32) -> (i32, i32, i32) {
    %c0_i32 = arith.constant 0 : i32
    %c0_i32_0 = arith.constant 0 : i32
    %c0_i32_1 = arith.constant 0 : i32
    %c0_i32_2 = arith.constant 0 : i32
    return %c0_i32, %c0_i32_0, %c0_i32_1 : i32, i32, i32
  }
  func.func @transform_6(%arg0: i32) -> (i32, i32, i32) {
    %c0_i32 = arith.constant 0 : i32
    %c0_i32_0 = arith.constant 0 : i32
    %c0_i32_1 = arith.constant 0 : i32
    %c0_i32_2 = arith.constant 0 : i32
    return %c0_i32, %c0_i32_0, %c0_i32_1 : i32, i32, i32
  }
  func.func @transform_7(%arg0: i32) -> (i32, i32) {
    %c0_i32 = arith.constant 0 : i32
    %c0_i32_0 = arith.constant 0 : i32
    return %arg0, %c0_i32 : i32, i32
  }
}

</mosaic_0001>

<bundles_post_ra>
// kernel: fused_forward.1
= control target key start
LH: loop header
LB: loop body
LE: loop exit
PB: predicated region body
PF: predicated region fallthrough
CT: control target
= control target key end

     0   :  { %12 = vsyncpa [#allocation3], 0  ;;  %s618_s0 = inlined_call_operand.hbm [shape: f32[8,32], index: 0, kind: input, shape index: {}]   ;;  %s619_s1 = inlined_call_operand.hbm [shape: f32[32,256], index: 1, kind: input, shape index: {}]   ;;  %s620_s2 = inlined_call_operand.vmem [shape: f32[1,256], index: 2, kind: input, shape index: {}]   ;;  %s621_s3 = inlined_call_operand.hbm [shape: f32[3,128,128], index: 3, kind: input, shape index: {}]   ;;  %s622_s4 = inlined_call_operand.vmem [shape: f32[3,1,128], index: 4, kind: input, shape index: {}]   ;;  %s623_s5 = inlined_call_operand.hbm [shape: f32[2,128,128], index: 5, kind: input, shape index: {}]   ;;  %s624_s6 = inlined_call_operand.hbm [shape: f32[2,1,128], index: 6, kind: input, shape index: {}]   ;;  %s625_s7 = inlined_call_operand.vmem [shape: f32[8,256], index: 7, kind: output, shape index: {}]  }
   0x1   :  { %13 = vsyncpa [#allocation5], 0  ;;  %s30_s26 = sshll.u32 %s619_s1, 4  ;;  %s31_s26 = int_to_ptr.hbm [resolvable:$true] %s30_s26 }
   0x2   :  { %14 = vsyncpa [#allocation8], 0  ;;  %s530_s27 = smov [#allocation4]   ;;  %s531_s29 = smov 256  }
   0x3   :  { %s32_s28 = sshll.u32 %s530_s27, 4  ;;  %s532_s30 = smov 16   ;;  %s33_s28 = int_to_ptr.vmem [resolvable:$true] %s32_s28 }
   0x4   :  { %38 = dma.hbm_to_vmem [thread:$0]  %s31_s26, 1024, %s33_s28, [#allocation5], %s531_s29, %s531_s29, %s532_s30  }
   0x5   :  { %s60_s10 = sshll.u32 %s623_s5, 4  ;;  %s533_s11 = smov [#allocation7]   ;;  %s61_s10 = int_to_ptr.hbm [resolvable:$true] %s60_s10 }
   0x6   :  { %s62_s12 = sshll.u32 %s533_s11, 4  ;;  %s20_s1 = sshll.u32 %s618_s0, 4  ;;  %s63_s12 = int_to_ptr.vmem [resolvable:$true] %s62_s12  ;;  %s21_s1 = int_to_ptr.hbm [resolvable:$true] %s20_s1 }
   0x7   :  { %s534_s15 = smov 128   ;;  %s535_s16 = smov 8  }
   0x8   :  { %68 = dma.hbm_to_vmem [thread:$0]  %s61_s10, 4096, %s63_s12, [#allocation8], %s534_s15, %s534_s15, %s535_s16  }
   0x9   :  { %s45_s19 = sshll.u32 %s621_s3, 4  ;;  %s536_s20 = smov [#allocation2]   ;;  %s46_s19 = int_to_ptr.hbm [resolvable:$true] %s45_s19 }
   0xa   :  { %s22_s21 = sshll.u32 %s536_s20, 4  ;;  %s537_s5 = smov [#allocation6]   ;;  %s23_s21 = int_to_ptr.vmem [resolvable:$true] %s22_s21 }
   0xb   :  { %25 = dma.hbm_to_vmem [thread:$0]  %s21_s1, 128, %s23_s21, [#allocation3]  }
   0xc   :  { %s47_s22 = sshll.u32 %s537_s5, 4  ;;  %s73_s0 = sshll.u32 %s624_s6, 4  ;;  %s48_s22 = int_to_ptr.vmem [resolvable:$true] %s47_s22  ;;  %s74_s0 = int_to_ptr.hbm [resolvable:$true] %s73_s0 }
   0xd   :  { %53 = dma.hbm_to_vmem [thread:$0]  %s46_s19, 6144, %s48_s22, [#allocation5], %s534_s15, %s534_s15, %s535_s16  }
   0xe   :  { %s538_s25 = smov [#allocation9]   ;;  %s539_s27 = smov 1  }
   0xf   :  { %s75_s26 = sshll.u32 %s538_s25, 4  ;;  %s76_s26 = int_to_ptr.vmem [resolvable:$true] %s75_s26 }
  0x10   :  { %81 = dma.hbm_to_vmem [thread:$0]  %s74_s0, 32, %s76_s26, [#allocation8], %s532_s30, %s532_s30, %s539_s27  }
  0x11   :  { %524 = dma.done.wait [#allocation3], 128  }
  0x12   :  { %525 = vsyncadd [#allocation3], 4294967168 }
  0x13   :  { %526 = dma.done.wait [#allocation5], 7168  }
  0x14   :  { %527 = vsyncadd [#allocation5], 4294960128 }
  0x15   :  { %528 = dma.done.wait [#allocation8], 4128  }
  0x16   :  { %529 = vsyncadd [#allocation8], 4294963168  ;;  %v109_v0 = vld [vmem:[#allocation4 + $0x30] sm:$0xff]  ;;  %v107_v1 = vld [vmem:[#allocation4 + $0x20] sm:$0xff]  ;;  %vm117_vm0 = vcmask 261120  }
  0x17   :  { %133 = vmatpush.msra.mxu0 %v109_v0  ;;  %v181_v2 = vld [vmem:[#allocation6 + $0x78] sm:$0xff]  ;;  %v105_v3 = vld [vmem:[#allocation4 + $0x10] sm:$0xff]  ;;  %v179_v5 = vld [vmem:[#allocation6 + $0x68] sm:$0xff] }
  0x18   :  { %186 = vmatpush.msra.mxu2 %v181_v2  ;;  %v180_v4 = vld [vmem:[#allocation6 + $0x70] sm:$0xff]  ;;  %v103_v6 = vld [vmem:[#allocation4] sm:$0xff]  ;;  %v102_v7 = vld [vmem:[#allocation2] sm:$0xff] }
  0x19   :  { %134 = vmatpush.msra.mxu0 %v107_v1  ;;  %v178_v8 = vld [vmem:[#allocation6 + $0x60] sm:$0xff]  ;;  %v177_v9 = vld [vmem:[#allocation6 + $0x58] sm:$0xff]  ;;  %v176_v10 = vld [vmem:[#allocation6 + $0x50] sm:$0xff] }
  0x1a   :  { %187 = vmatpush.msra.mxu2 %v180_v4  ;;  %v175_v11 = vld [vmem:[#allocation6 + $0x48] sm:$0xff]  ;;  %v174_v12 = vld [vmem:[#allocation6 + $0x40] sm:$0xff]  ;;  %v173_v13 = vld [vmem:[#allocation6 + $0x38] sm:$0xff] }
  0x1b   :  { %135 = vmatpush.msra.mxu0 %v105_v3  ;;  %v172_v14 = vld [vmem:[#allocation6 + $0x30] sm:$0xff]  ;;  %v171_v15 = vld [vmem:[#allocation6 + $0x28] sm:$0xff]  ;;  %v170_v16 = vld [vmem:[#allocation6 + $0x20] sm:$0xff] }
  0x1c   :  { %188 = vmatpush.msra.mxu2 %v179_v5  ;;  %v169_v17 = vld [vmem:[#allocation6 + $0x18] sm:$0xff]  ;;  %v168_v18 = vld [vmem:[#allocation6 + $0x10] sm:$0xff]  ;;  %v167_v19 = vld [vmem:[#allocation6 + $0x8] sm:$0xff] }
  0x1d   :  { %136 = vmatpush.msra.mxu0 %v103_v6  ;;  %v110_v20 = vld [vmem:[#allocation4 + $0x38] sm:$0xff]  ;;  %v108_v21 = vld [vmem:[#allocation4 + $0x28] sm:$0xff]  ;;  %v166_v22 = vld [vmem:[#allocation6] sm:$0xff] }
  0x1e   :  { %385 = vmatmul.msk.f32.vlgmr.msra.gmra.mxu0 %vm117_vm0, %v102_v7  ;;  %189 = vmatpush.msra.mxu2 %v178_v8  ;;  %v106_v23 = vld [vmem:[#allocation4 + $0x18] sm:$0xff]  ;;  %v222_v25 = vld [vmem:[#allocation6 + $0xf0] sm:$0xff]  ;;  %v104_v26 = vld [vmem:[#allocation4 + $0x8] sm:$0xff] }
  0x1f   :  { %153 = vmatpush.msra.mxu1 %v110_v20  ;;  %v223_v24 = vld [vmem:[#allocation6 + $0xf8] sm:$0xff]  ;;  %v221_v27 = vld [vmem:[#allocation6 + $0xe8] sm:$0xff]  ;;  %v220_v29 = vld [vmem:[#allocation6 + $0xe0] sm:$0xff] }
  0x20   :  { %190 = vmatpush.msra.mxu2 %v177_v9  ;;  %229 = vmatpush.msra.mxu3 %v223_v24  ;;  %v309_v28 = vld [vmem:[#allocation7 + $0x78] sm:$0xff]  ;;  %v308_v30 = vld [vmem:[#allocation7 + $0x70] sm:$0xff]  ;;  %v307_v32 = vld [vmem:[#allocation7 + $0x68] sm:$0xff] }
  0x21   :  { %154 = vmatpush.msra.mxu1 %v108_v21  ;;  %v219_v31 = vld [vmem:[#allocation6 + $0xd8] sm:$0xff]  ;;  %v218_v33 = vld [vmem:[#allocation6 + $0xd0] sm:$0xff]  ;;  %v306_v34 = vld [vmem:[#allocation7 + $0x60] sm:$0xff] }
  0x22   :  { %191 = vmatpush.msra.mxu2 %v176_v10  ;;  %230 = vmatpush.msra.mxu3 %v222_v25  ;;  %v217_v35 = vld [vmem:[#allocation6 + $0xc8] sm:$0xff]  ;;  %v305_v36 = vld [vmem:[#allocation7 + $0x58] sm:$0xff]  ;;  %v216_v37 = vld [vmem:[#allocation6 + $0xc0] sm:$0xff] }
  0x23   :  { %155 = vmatpush.msra.mxu1 %v106_v23  ;;  %v304_v38 = vld [vmem:[#allocation7 + $0x50] sm:$0xff]  ;;  %v215_v39 = vld [vmem:[#allocation6 + $0xb8] sm:$0xff]  ;;  %v303_v40 = vld [vmem:[#allocation7 + $0x48] sm:$0xff] }
  0x24   :  { %192 = vmatpush.msra.mxu2 %v175_v11  ;;  %231 = vmatpush.msra.mxu3 %v221_v27  ;;  %v302_v41 = vld [vmem:[#allocation7 + $0x40] sm:$0xff]  ;;  %v301_v42 = vld [vmem:[#allocation7 + $0x38] sm:$0xff]  ;;  %v214_v48 = vld [vmem:[#allocation6 + $0xb0] sm:$0xff] }
  0x25   :  { %156 = vmatpush.msra.mxu1 %v104_v26  ;;  %v111_v43 = vld [vmem:[%s620_s2] sm:$0x3]  ;;  %v300_v49 = vld [vmem:[#allocation7 + $0x30] sm:$0xff]  ;;  %v213_v50 = vld [vmem:[#allocation6 + $0xa8] sm:$0xff] }
  0x26   :  { %193 = vmatpush.msra.mxu2 %v174_v12  ;;  %386 = vmatmul.msk.f32.vlgmr.msra.gmra.mxu1 %vm117_vm0, %v102_v7  ;;  %v113_v44 = vperm.slane %v111_v43, 0  ;;  %v299_v51 = vld [vmem:[#allocation7 + $0x28] sm:$0xff]  ;;  %v212_v52 = vld [vmem:[#allocation6 + $0xa0] sm:$0xff]  ;;  %v211_v54 = vld [vmem:[#allocation6 + $0x98] sm:$0xff]  ;;  %v114_v56 = vperm.slane %v111_v43, 1 }
  0x27   :  { %314 = vmatpush.msrb.mxu1 %v309_v28  ;;  %232 = vmatpush.msra.mxu3 %v220_v29  ;;  %v298_v53 = vld [vmem:[#allocation7 + $0x20] sm:$0xff]  ;;  %v297_v55 = vld [vmem:[#allocation7 + $0x18] sm:$0xff]  ;;  %v210_v57 = vld [vmem:[#allocation6 + $0x90] sm:$0xff] }
  0x28   :  { %194 = vmatpush.msra.mxu2 %v173_v13  ;;  %v296_v58 = vld [vmem:[#allocation7 + $0x10] sm:$0xff]  ;;  %v209_v61 = vld [vmem:[#allocation6 + $0x88] sm:$0xff]  ;;  %v208_v0 = vld [vmem:[#allocation6 + $0x80] sm:$0xff] }
  0x29   :  { %315 = vmatpush.msrb.mxu1 %v308_v30  ;;  %233 = vmatpush.msra.mxu3 %v219_v31  ;;  %v295_v62 = vld [vmem:[#allocation7 + $0x8] sm:$0xff]  ;;  %v294_v1 = vld [vmem:[#allocation7] sm:$0xff]  ;;  %v351_v2 = vld [vmem:[#allocation7 + $0xf8] sm:$0xff] }
  0x2a   :  { %195 = vmatpush.msra.mxu2 %v172_v14  ;;  %v350_v3 = vld [vmem:[#allocation7 + $0xf0] sm:$0xff]  ;;  %v266_v4 = vld [vmem:[#allocation6 + $0x178] sm:$0xff]  ;;  %v349_v6 = vld [vmem:[#allocation7 + $0xe8] sm:$0xff] }
  0x2b   :  { %316 = vmatpush.msrb.mxu1 %v307_v32  ;;  %234 = vmatpush.msra.mxu3 %v218_v33  ;;  %v265_v5 = vld [vmem:[#allocation6 + $0x170] sm:$0xff]  ;;  %v264_v7 = vld [vmem:[#allocation6 + $0x168] sm:$0xff]  ;;  %v348_v8 = vld [vmem:[#allocation7 + $0xe0] sm:$0xff] }
  0x2c   :  { %196 = vmatpush.msra.mxu2 %v171_v15  ;;  %272 = vmatpush.msrb.mxu0 %v266_v4  ;;  %v263_v9 = vld [vmem:[#allocation6 + $0x160] sm:$0xff]  ;;  %v347_v10 = vld [vmem:[#allocation7 + $0xd8] sm:$0xff]  ;;  %v346_v12 = vld [vmem:[#allocation7 + $0xd0] sm:$0xff] }
  0x2d   :  { %317 = vmatpush.msrb.mxu1 %v306_v34  ;;  %235 = vmatpush.msra.mxu3 %v217_v35  ;;  %v262_v11 = vld [vmem:[#allocation6 + $0x158] sm:$0xff]  ;;  %v261_v13 = vld [vmem:[#allocation6 + $0x150] sm:$0xff]  ;;  %v345_v14 = vld [vmem:[#allocation7 + $0xc8] sm:$0xff] }
  0x2e   :  { %197 = vmatpush.msra.mxu2 %v170_v16  ;;  %273 = vmatpush.msrb.mxu0 %v265_v5  ;;  %v260_v15 = vld [vmem:[#allocation6 + $0x148] sm:$0xff]  ;;  %v344_v16 = vld [vmem:[#allocation7 + $0xc0] sm:$0xff]  ;;  %v342_v20 = vld [vmem:[#allocation7 + $0xb0] sm:$0xff] }
  0x2f   :  { %318 = vmatpush.msrb.mxu1 %v305_v36  ;;  %236 = vmatpush.msra.mxu3 %v216_v37  ;;  %v257_v21 = vld [vmem:[#allocation6 + $0x130] sm:$0xff]  ;;  %v256_v23 = vld [vmem:[#allocation6 + $0x128] sm:$0xff]  ;;  %v340_v24 = vld [vmem:[#allocation7 + $0xa0] sm:$0xff] }
  0x30   :  { %198 = vmatpush.msra.mxu2 %v169_v17  ;;  %274 = vmatpush.msrb.mxu0 %v264_v7  ;;  %v259_v17 = vld [vmem:[#allocation6 + $0x140] sm:$0xff]  ;;  %v339_v25 = vld [vmem:[#allocation7 + $0x98] sm:$0xff]  ;;  %v338_v30 = vld [vmem:[#allocation7 + $0x90] sm:$0xff] }
  0x31   :  { %319 = vmatpush.msrb.mxu1 %v304_v38  ;;  %237 = vmatpush.msra.mxu3 %v215_v39  ;;  %v399_v26 = vld [vmem:[%s622_s4] ss:$0 sm:$0xff]  ;;  %v255_v31 = vld [vmem:[#allocation6 + $0x120] sm:$0xff]  ;;  %v337_v32 = vld [vmem:[#allocation7 + $0x88] sm:$0xff] }
  0x32   :  { %199 = vmatpush.msra.mxu2 %v168_v18  ;;  %275 = vmatpush.msrb.mxu0 %v263_v9  ;;  %v343_v18 = vld [vmem:[#allocation7 + $0xb8] sm:$0xff]  ;;  %v336_v34 = vld [vmem:[#allocation7 + $0x80] sm:$0xff]  ;;  %v253_v39 = vld [vmem:[#allocation6 + $0x110] sm:$0xff] }
  0x33   :  { %320 = vmatpush.msrb.mxu1 %v303_v40  ;;  %238 = vmatpush.msra.mxu3 %v214_v48  ;;  %v254_v33 = vld [vmem:[#allocation6 + $0x118] sm:$0xff]  ;;  %v400_v35 = vld [vmem:[#allocation9] ss:$0 sm:$0xff]  ;;  %v252_v40 = vld [vmem:[#allocation6 + $0x108] sm:$0xff] }
  0x34   :  { %200 = vmatpush.msra.mxu2 %v167_v19  ;;  %276 = vmatpush.msrb.mxu0 %v262_v11  ;;  %v258_v19 = vld [vmem:[#allocation6 + $0x138] sm:$0xff] }
  0x35   :  { %321 = vmatpush.msrb.mxu1 %v302_v41  ;;  %239 = vmatpush.msra.mxu3 %v213_v50  ;;  %v251_v41 = vld [vmem:[#allocation6 + $0x100] sm:$0xff] }
  0x36   :  { %201 = vmatpush.msra.mxu2 %v166_v22  ;;  %277 = vmatpush.msrb.mxu0 %v261_v13  ;;  %v341_v22 = vld [vmem:[#allocation7 + $0xa8] sm:$0xff] }
  0x37   :  { %322 = vmatpush.msrb.mxu1 %v301_v42  ;;  %240 = vmatpush.msra.mxu3 %v212_v52  ;;  %v401_v42 = vld [vmem:[%s622_s4 + $0x1] ss:$0 sm:$0xff] }
  0x38   :  { %357 = vmatpush.msrb.mxu2 %v351_v2  ;;  %278 = vmatpush.msrb.mxu0 %v260_v15 }
  0x39   :  { %323 = vmatpush.msrb.mxu1 %v300_v49  ;;  %241 = vmatpush.msra.mxu3 %v211_v54  ;;  %v402_v49 = vld [vmem:[%s622_s4 + $0x2] ss:$0 sm:$0xff] }
  0x3a   :  { %358 = vmatpush.msrb.mxu2 %v350_v3  ;;  %279 = vmatpush.msrb.mxu0 %v259_v17 }
  0x3b   :  { %324 = vmatpush.msrb.mxu1 %v299_v51  ;;  %242 = vmatpush.msra.mxu3 %v210_v57 }
  0x3c   :  { %359 = vmatpush.msrb.mxu2 %v349_v6  ;;  %280 = vmatpush.msrb.mxu0 %v258_v19 }
  0x3d   :  { %325 = vmatpush.msrb.mxu1 %v298_v53  ;;  %243 = vmatpush.msra.mxu3 %v209_v61 }
  0x3e   :  { %360 = vmatpush.msrb.mxu2 %v348_v8  ;;  %281 = vmatpush.msrb.mxu0 %v257_v21 }
  0x3f   :  { %326 = vmatpush.msrb.mxu1 %v297_v55  ;;  %244 = vmatpush.msra.mxu3 %v208_v0 }
  0x40   :  { %361 = vmatpush.msrb.mxu2 %v347_v10  ;;  %282 = vmatpush.msrb.mxu0 %v256_v23 }
  0x41   :  { %327 = vmatpush.msrb.mxu1 %v296_v58 }
  0x42   :  { %362 = vmatpush.msrb.mxu2 %v346_v12  ;;  %283 = vmatpush.msrb.mxu0 %v255_v31 }
  0x43   :  { %328 = vmatpush.msrb.mxu1 %v295_v62 }
  0x44   :  { %363 = vmatpush.msrb.mxu2 %v345_v14  ;;  %284 = vmatpush.msrb.mxu0 %v254_v33 }
  0x45   :  { %329 = vmatpush.msrb.mxu1 %v294_v1 }
  0x46   :  { %364 = vmatpush.msrb.mxu2 %v344_v16  ;;  %285 = vmatpush.msrb.mxu0 %v253_v39 }
  0x48   :  { %365 = vmatpush.msrb.mxu2 %v343_v18  ;;  %286 = vmatpush.msrb.mxu0 %v252_v40 }
  0x4a   :  { %366 = vmatpush.msrb.mxu2 %v342_v20  ;;  %287 = vmatpush.msrb.mxu0 %v251_v41 }
  0x4c   :  { %367 = vmatpush.msrb.mxu2 %v341_v22 }
  0x4e   :  { %368 = vmatpush.msrb.mxu2 %v340_v24 }
  0x50   :  { %369 = vmatpush.msrb.mxu2 %v339_v25 }
  0x52   :  { %370 = vmatpush.msrb.mxu2 %v338_v30 }
  0x54   :  { %371 = vmatpush.msrb.mxu2 %v337_v32 }
  0x56   :  { %372 = vmatpush.msrb.mxu2 %v336_v34 }
  0x9b   :  { %v138_v45 = vpop.f32.mrf.mxu0 }
  0x9c   :  { %v139_v46 = vadd.f32 %v138_v45, %v113_v44 }
  0x9e   :  { %v161_v47 = vmax.f32 %v139_v46, 0.0  ;;  %v403_v46 = vld [vmem:[#allocation9 + $0x1] ss:$0 sm:$0xff] }
  0xa0   :  { %202 = vmatmul.f32.vlgmr.msra.gmra.mxu2 %v161_v47 }
  0xa3   :  { %v158_v59 = vpop.f32.mrf.mxu1 }
  0xa4   :  { %v159_v60 = vadd.f32 %v158_v59, %v114_v56 }
  0xa6   :  { %v162_v63 = vmax.f32 %v159_v60, 0.0 }
  0xa8   :  { %330 = vmatmul.f32.vlgmr.msrb.gmra.mxu1 %v162_v63 }
 0x123   :  { %v203_v27 = vpop.f32.mrf.mxu2 }
 0x124   :  { %v204_v28 = vadd.f32 %v399_v26, %v203_v27 }
 0x125   :  { %v331_v36 = vpop.f32.mrf.mxu1 }
 0x126   :  { %v206_v29 = vmax.f32 %v204_v28, 0.0  ;;  %v332_v37 = vadd.f32 %v400_v35, %v331_v36 }
 0x128   :  { %245 = vmatmul.f32.vlgmr.msra.gmra.mxu3 %v206_v29  ;;  %v334_v38 = vmax.f32 %v332_v37, 0.0 }
 0x12a   :  { %373 = vmatmul.f32.vlgmr.msrb.gmra.mxu2 %v334_v38 }
 0x1ab   :  { %v246_v43 = vpop.f32.mrf.mxu3 }
 0x1ac   :  { %v247_v44 = vadd.f32 %v401_v42, %v246_v43 }
 0x1ad   :  { %v374_v47 = vpop.f32.mrf.mxu2 }
 0x1ae   :  { %v249_v45 = vmax.f32 %v247_v44, 0.0  ;;  %v375_v48 = vadd.f32 %v403_v46, %v374_v47 }
 0x1b0   :  { %288 = vmatmul.f32.vlgmr.msrb.gmra.mxu0 %v249_v45  ;;  %377 = vst [vmem:[%s625_s7 + $0x8] sm:$0xff] %v375_v48 }
 0x22d   :  { %v289_v50 = vpop.f32.mrf.mxu0 }
 0x22e   :  { %v290_v51 = vadd.f32 %v402_v49, %v289_v50 }
 0x230   :  { %292 = vst [vmem:[%s625_s7] sm:$0xff] %v290_v51 }
 0x231   :  { %382 = vsyncpa [#allocation3], 1 }
 0x232   :  { %383 = vsyncpa [#allocation5], 1 }
 0x233   :  { %384 = vsyncpa [#allocation8], 1 }

// kernel: fused_forward.1
= control target key start
LH: loop header
LB: loop body
LE: loop exit
PB: predicated region body
PF: predicated region fallthrough
CT: control target
= control target key end

     0   :  { %12 = vsyncpa [#allocation3], 0  ;;  %s618_s0 = inlined_call_operand.hbm [shape: f32[8,32], index: 0, kind: input, shape index: {}]   ;;  %s619_s1 = inlined_call_operand.hbm [shape: f32[32,256], index: 1, kind: input, shape index: {}]   ;;  %s620_s2 = inlined_call_operand.vmem [shape: f32[1,256], index: 2, kind: input, shape index: {}]   ;;  %s621_s3 = inlined_call_operand.hbm [shape: f32[3,128,128], index: 3, kind: input, shape index: {}]   ;;  %s622_s4 = inlined_call_operand.vmem [shape: f32[3,1,128], index: 4, kind: input, shape index: {}]   ;;  %s623_s5 = inlined_call_operand.hbm [shape: f32[2,128,128], index: 5, kind: input, shape index: {}]   ;;  %s624_s6 = inlined_call_operand.hbm [shape: f32[2,1,128], index: 6, kind: input, shape index: {}]   ;;  %s625_s7 = inlined_call_operand.vmem [shape: f32[8,256], index: 7, kind: output, shape index: {}]  }
   0x1   :  { %13 = vsyncpa [#allocation5], 0  ;;  %s30_s26 = sshll.u32 %s619_s1, 4  ;;  %s31_s26 = int_to_ptr.hbm [resolvable:$true] %s30_s26 }
   0x2   :  { %14 = vsyncpa [#allocation8], 0  ;;  %s530_s27 = smov [#allocation4]   ;;  %s531_s29 = smov 256  }
   0x3   :  { %s32_s28 = sshll.u32 %s530_s27, 4  ;;  %s532_s30 = smov 16   ;;  %s33_s28 = int_to_ptr.vmem [resolvable:$true] %s32_s28 }
   0x4   :  { %38 = dma.hbm_to_vmem [thread:$0]  %s31_s26, 1024, %s33_s28, [#allocation5], %s531_s29, %s531_s29, %s532_s30  }
   0x5   :  { %s60_s10 = sshll.u32 %s623_s5, 4  ;;  %s533_s11 = smov [#allocation7]   ;;  %s61_s10 = int_to_ptr.hbm [resolvable:$true] %s60_s10 }
   0x6   :  { %s62_s12 = sshll.u32 %s533_s11, 4  ;;  %s20_s1 = sshll.u32 %s618_s0, 4  ;;  %s63_s12 = int_to_ptr.vmem [resolvable:$true] %s62_s12  ;;  %s21_s1 = int_to_ptr.hbm [resolvable:$true] %s20_s1 }
   0x7   :  { %s534_s15 = smov 128   ;;  %s535_s16 = smov 8  }
   0x8   :  { %68 = dma.hbm_to_vmem [thread:$0]  %s61_s10, 4096, %s63_s12, [#allocation8], %s534_s15, %s534_s15, %s535_s16  }
   0x9   :  { %s45_s19 = sshll.u32 %s621_s3, 4  ;;  %s536_s20 = smov [#allocation2]   ;;  %s46_s19 = int_to_ptr.hbm [resolvable:$true] %s45_s19 }
   0xa   :  { %s22_s21 = sshll.u32 %s536_s20, 4  ;;  %s537_s5 = smov [#allocation6]   ;;  %s23_s21 = int_to_ptr.vmem [resolvable:$true] %s22_s21 }
   0xb   :  { %25 = dma.hbm_to_vmem [thread:$0]  %s21_s1, 128, %s23_s21, [#allocation3]  }
   0xc   :  { %s47_s22 = sshll.u32 %s537_s5, 4  ;;  %s73_s0 = sshll.u32 %s624_s6, 4  ;;  %s48_s22 = int_to_ptr.vmem [resolvable:$true] %s47_s22  ;;  %s74_s0 = int_to_ptr.hbm [resolvable:$true] %s73_s0 }
   0xd   :  { %53 = dma.hbm_to_vmem [thread:$0]  %s46_s19, 6144, %s48_s22, [#allocation5], %s534_s15, %s534_s15, %s535_s16  }
   0xe   :  { %s538_s25 = smov [#allocation9]   ;;  %s539_s27 = smov 1  }
   0xf   :  { %s75_s26 = sshll.u32 %s538_s25, 4  ;;  %s76_s26 = int_to_ptr.vmem [resolvable:$true] %s75_s26 }
  0x10   :  { %81 = dma.hbm_to_vmem [thread:$0]  %s74_s0, 32, %s76_s26, [#allocation8], %s532_s30, %s532_s30, %s539_s27  }
  0x11   :  { %524 = dma.done.wait [#allocation3], 128  }
  0x12   :  { %525 = vsyncadd [#allocation3], 4294967168 }
  0x13   :  { %526 = dma.done.wait [#allocation5], 7168  }
  0x14   :  { %527 = vsyncadd [#allocation5], 4294960128 }
  0x15   :  { %528 = dma.done.wait [#allocation8], 4128  }
  0x16   :  { %529 = vsyncadd [#allocation8], 4294963168  ;;  %v109_v0 = vld [vmem:[#allocation4 + $0x30] sm:$0xff]  ;;  %v107_v1 = vld [vmem:[#allocation4 + $0x20] sm:$0xff]  ;;  %vm117_vm0 = vcmask 261120  }
  0x17   :  { %133 = vmatpush.msra.mxu0 %v109_v0  ;;  %v181_v2 = vld [vmem:[#allocation6 + $0x78] sm:$0xff]  ;;  %v105_v3 = vld [vmem:[#allocation4 + $0x10] sm:$0xff]  ;;  %v179_v5 = vld [vmem:[#allocation6 + $0x68] sm:$0xff] }
  0x18   :  { %186 = vmatpush.msra.mxu2 %v181_v2  ;;  %v180_v4 = vld [vmem:[#allocation6 + $0x70] sm:$0xff]  ;;  %v103_v6 = vld [vmem:[#allocation4] sm:$0xff]  ;;  %v102_v7 = vld [vmem:[#allocation2] sm:$0xff] }
  0x19   :  { %134 = vmatpush.msra.mxu0 %v107_v1  ;;  %v178_v8 = vld [vmem:[#allocation6 + $0x60] sm:$0xff]  ;;  %v177_v9 = vld [vmem:[#allocation6 + $0x58] sm:$0xff]  ;;  %v176_v10 = vld [vmem:[#allocation6 + $0x50] sm:$0xff] }
  0x1a   :  { %187 = vmatpush.msra.mxu2 %v180_v4  ;;  %v175_v11 = vld [vmem:[#allocation6 + $0x48] sm:$0xff]  ;;  %v174_v12 = vld [vmem:[#allocation6 + $0x40] sm:$0xff]  ;;  %v173_v13 = vld [vmem:[#allocation6 + $0x38] sm:$0xff] }
  0x1b   :  { %135 = vmatpush.msra.mxu0 %v105_v3  ;;  %v172_v14 = vld [vmem:[#allocation6 + $0x30] sm:$0xff]  ;;  %v171_v15 = vld [vmem:[#allocation6 + $0x28] sm:$0xff]  ;;  %v170_v16 = vld [vmem:[#allocation6 + $0x20] sm:$0xff] }
  0x1c   :  { %188 = vmatpush.msra.mxu2 %v179_v5  ;;  %v169_v17 = vld [vmem:[#allocation6 + $0x18] sm:$0xff]  ;;  %v168_v18 = vld [vmem:[#allocation6 + $0x10] sm:$0xff]  ;;  %v167_v19 = vld [vmem:[#allocation6 + $0x8] sm:$0xff] }
  0x1d   :  { %136 = vmatpush.msra.mxu0 %v103_v6  ;;  %v110_v20 = vld [vmem:[#allocation4 + $0x38] sm:$0xff]  ;;  %v108_v21 = vld [vmem:[#allocation4 + $0x28] sm:$0xff]  ;;  %v166_v22 = vld [vmem:[#allocation6] sm:$0xff] }
  0x1e   :  { %385 = vmatmul.msk.f32.vlgmr.msra.gmra.mxu0 %vm117_vm0, %v102_v7  ;;  %189 = vmatpush.msra.mxu2 %v178_v8  ;;  %v106_v23 = vld [vmem:[#allocation4 + $0x18] sm:$0xff]  ;;  %v222_v25 = vld [vmem:[#allocation6 + $0xf0] sm:$0xff]  ;;  %v104_v26 = vld [vmem:[#allocation4 + $0x8] sm:$0xff] }
  0x1f   :  { %153 = vmatpush.msra.mxu1 %v110_v20  ;;  %v223_v24 = vld [vmem:[#allocation6 + $0xf8] sm:$0xff]  ;;  %v221_v27 = vld [vmem:[#allocation6 + $0xe8] sm:$0xff]  ;;  %v220_v29 = vld [vmem:[#allocation6 + $0xe0] sm:$0xff] }
  0x20   :  { %190 = vmatpush.msra.mxu2 %v177_v9  ;;  %229 = vmatpush.msra.mxu3 %v223_v24  ;;  %v309_v28 = vld [vmem:[#allocation7 + $0x78] sm:$0xff]  ;;  %v308_v30 = vld [vmem:[#allocation7 + $0x70] sm:$0xff]  ;;  %v307_v32 = vld [vmem:[#allocation7 + $0x68] sm:$0xff] }
  0x21   :  { %154 = vmatpush.msra.mxu1 %v108_v21  ;;  %v219_v31 = vld [vmem:[#allocation6 + $0xd8] sm:$0xff]  ;;  %v218_v33 = vld [vmem:[#allocation6 + $0xd0] sm:$0xff]  ;;  %v306_v34 = vld [vmem:[#allocation7 + $0x60] sm:$0xff] }
  0x22   :  { %191 = vmatpush.msra.mxu2 %v176_v10  ;;  %230 = vmatpush.msra.mxu3 %v222_v25  ;;  %v217_v35 = vld [vmem:[#allocation6 + $0xc8] sm:$0xff]  ;;  %v305_v36 = vld [vmem:[#allocation7 + $0x58] sm:$0xff]  ;;  %v216_v37 = vld [vmem:[#allocation6 + $0xc0] sm:$0xff] }
  0x23   :  { %155 = vmatpush.msra.mxu1 %v106_v23  ;;  %v304_v38 = vld [vmem:[#allocation7 + $0x50] sm:$0xff]  ;;  %v215_v39 = vld [vmem:[#allocation6 + $0xb8] sm:$0xff]  ;;  %v303_v40 = vld [vmem:[#allocation7 + $0x48] sm:$0xff] }
  0x24   :  { %192 = vmatpush.msra.mxu2 %v175_v11  ;;  %231 = vmatpush.msra.mxu3 %v221_v27  ;;  %v302_v41 = vld [vmem:[#allocation7 + $0x40] sm:$0xff]  ;;  %v301_v42 = vld [vmem:[#allocation7 + $0x38] sm:$0xff]  ;;  %v214_v48 = vld [vmem:[#allocation6 + $0xb0] sm:$0xff] }
  0x25   :  { %156 = vmatpush.msra.mxu1 %v104_v26  ;;  %v111_v43 = vld [vmem:[%s620_s2] sm:$0x3]  ;;  %v300_v49 = vld [vmem:[#allocation7 + $0x30] sm:$0xff]  ;;  %v213_v50 = vld [vmem:[#allocation6 + $0xa8] sm:$0xff] }
  0x26   :  { %193 = vmatpush.msra.mxu2 %v174_v12  ;;  %386 = vmatmul.msk.f32.vlgmr.msra.gmra.mxu1 %vm117_vm0, %v102_v7  ;;  %v113_v44 = vperm.slane %v111_v43, 0  ;;  %v299_v51 = vld [vmem:[#allocation7 + $0x28] sm:$0xff]  ;;  %v212_v52 = vld [vmem:[#allocation6 + $0xa0] sm:$0xff]  ;;  %v211_v54 = vld [vmem:[#allocation6 + $0x98] sm:$0xff]  ;;  %v114_v56 = vperm.slane %v111_v43, 1 }
  0x27   :  { %314 = vmatpush.msrb.mxu1 %v309_v28  ;;  %232 = vmatpush.msra.mxu3 %v220_v29  ;;  %v298_v53 = vld [vmem:[#allocation7 + $0x20] sm:$0xff]  ;;  %v297_v55 = vld [vmem:[#allocation7 + $0x18] sm:$0xff]  ;;  %v210_v57 = vld [vmem:[#allocation6 + $0x90] sm:$0xff] }
  0x28   :  { %194 = vmatpush.msra.mxu2 %v173_v13  ;;  %v296_v58 = vld [vmem:[#allocation7 + $0x10] sm:$0xff]  ;;  %v209_v61 = vld [vmem:[#allocation6 + $0x88] sm:$0xff]  ;;  %v208_v0 = vld [vmem:[#allocation6 + $0x80] sm:$0xff] }
  0x29   :  { %315 = vmatpush.msrb.mxu1 %v308_v30  ;;  %233 = vmatpush.msra.mxu3 %v219_v31  ;;  %v295_v62 = vld [vmem:[#allocation7 + $0x8] sm:$0xff]  ;;  %v294_v1 = vld [vmem:[#allocation7] sm:$0xff]  ;;  %v351_v2 = vld [vmem:[#allocation7 + $0xf8] sm:$0xff] }
  0x2a   :  { %195 = vmatpush.msra.mxu2 %v172_v14  ;;  %v350_v3 = vld [vmem:[#allocation7 + $0xf0] sm:$0xff]  ;;  %v266_v4 = vld [vmem:[#allocation6 + $0x178] sm:$0xff]  ;;  %v349_v6 = vld [vmem:[#allocation7 + $0xe8] sm:$0xff] }
  0x2b   :  { %316 = vmatpush.msrb.mxu1 %v307_v32  ;;  %234 = vmatpush.msra.mxu3 %v218_v33  ;;  %v265_v5 = vld [vmem:[#allocation6 + $0x170] sm:$0xff]  ;;  %v264_v7 = vld [vmem:[#allocation6 + $0x168] sm:$0xff]  ;;  %v348_v8 = vld [vmem:[#allocation7 + $0xe0] sm:$0xff] }
  0x2c   :  { %196 = vmatpush.msra.mxu2 %v171_v15  ;;  %272 = vmatpush.msrb.mxu0 %v266_v4  ;;  %v263_v9 = vld [vmem:[#allocation6 + $0x160] sm:$0xff]  ;;  %v347_v10 = vld [vmem:[#allocation7 + $0xd8] sm:$0xff]  ;;  %v346_v12 = vld [vmem:[#allocation7 + $0xd0] sm:$0xff] }
  0x2d   :  { %317 = vmatpush.msrb.mxu1 %v306_v34  ;;  %235 = vmatpush.msra.mxu3 %v217_v35  ;;  %v262_v11 = vld [vmem:[#allocation6 + $0x158] sm:$0xff]  ;;  %v261_v13 = vld [vmem:[#allocation6 + $0x150] sm:$0xff]  ;;  %v345_v14 = vld [vmem:[#allocation7 + $0xc8] sm:$0xff] }
  0x2e   :  { %197 = vmatpush.msra.mxu2 %v170_v16  ;;  %273 = vmatpush.msrb.mxu0 %v265_v5  ;;  %v260_v15 = vld [vmem:[#allocation6 + $0x148] sm:$0xff]  ;;  %v344_v16 = vld [vmem:[#allocation7 + $0xc0] sm:$0xff]  ;;  %v342_v20 = vld [vmem:[#allocation7 + $0xb0] sm:$0xff] }
  0x2f   :  { %318 = vmatpush.msrb.mxu1 %v305_v36  ;;  %236 = vmatpush.msra.mxu3 %v216_v37  ;;  %v257_v21 = vld [vmem:[#allocation6 + $0x130] sm:$0xff]  ;;  %v256_v23 = vld [vmem:[#allocation6 + $0x128] sm:$0xff]  ;;  %v340_v24 = vld [vmem:[#allocation7 + $0xa0] sm:$0xff] }
  0x30   :  { %198 = vmatpush.msra.mxu2 %v169_v17  ;;  %274 = vmatpush.msrb.mxu0 %v264_v7  ;;  %v259_v17 = vld [vmem:[#allocation6 + $0x140] sm:$0xff]  ;;  %v339_v25 = vld [vmem:[#allocation7 + $0x98] sm:$0xff]  ;;  %v338_v30 = vld [vmem:[#allocation7 + $0x90] sm:$0xff] }
  0x31   :  { %319 = vmatpush.msrb.mxu1 %v304_v38  ;;  %237 = vmatpush.msra.mxu3 %v215_v39  ;;  %v399_v26 = vld [vmem:[%s622_s4] ss:$0 sm:$0xff]  ;;  %v255_v31 = vld [vmem:[#allocation6 + $0x120] sm:$0xff]  ;;  %v337_v32 = vld [vmem:[#allocation7 + $0x88] sm:$0xff] }
  0x32   :  { %199 = vmatpush.msra.mxu2 %v168_v18  ;;  %275 = vmatpush.msrb.mxu0 %v263_v9  ;;  %v343_v18 = vld [vmem:[#allocation7 + $0xb8] sm:$0xff]  ;;  %v336_v34 = vld [vmem:[#allocation7 + $0x80] sm:$0xff]  ;;  %v253_v39 = vld [vmem:[#allocation6 + $0x110] sm:$0xff] }
  0x33   :  { %320 = vmatpush.msrb.mxu1 %v303_v40  ;;  %238 = vmatpush.msra.mxu3 %v214_v48  ;;  %v254_v33 = vld [vmem:[#allocation6 + $0x118] sm:$0xff]  ;;  %v400_v35 = vld [vmem:[#allocation9] ss:$0 sm:$0xff]  ;;  %v252_v40 = vld [vmem:[#allocation6 + $0x108] sm:$0xff] }
  0x34   :  { %200 = vmatpush.msra.mxu2 %v167_v19  ;;  %276 = vmatpush.msrb.mxu0 %v262_v11  ;;  %v258_v19 = vld [vmem:[#allocation6 + $0x138] sm:$0xff] }
  0x35   :  { %321 = vmatpush.msrb.mxu1 %v302_v41  ;;  %239 = vmatpush.msra.mxu3 %v213_v50  ;;  %v251_v41 = vld [vmem:[#allocation6 + $0x100] sm:$0xff] }
  0x36   :  { %201 = vmatpush.msra.mxu2 %v166_v22  ;;  %277 = vmatpush.msrb.mxu0 %v261_v13  ;;  %v341_v22 = vld [vmem:[#allocation7 + $0xa8] sm:$0xff] }
  0x37   :  { %322 = vmatpush.msrb.mxu1 %v301_v42  ;;  %240 = vmatpush.msra.mxu3 %v212_v52  ;;  %v401_v42 = vld [vmem:[%s622_s4 + $0x1] ss:$0 sm:$0xff] }
  0x38   :  { %357 = vmatpush.msrb.mxu2 %v351_v2  ;;  %278 = vmatpush.msrb.mxu0 %v260_v15 }
  0x39   :  { %323 = vmatpush.msrb.mxu1 %v300_v49  ;;  %241 = vmatpush.msra.mxu3 %v211_v54  ;;  %v402_v49 = vld [vmem:[%s622_s4 + $0x2] ss:$0 sm:$0xff] }
  0x3a   :  { %358 = vmatpush.msrb.mxu2 %v350_v3  ;;  %279 = vmatpush.msrb.mxu0 %v259_v17 }
  0x3b   :  { %324 = vmatpush.msrb.mxu1 %v299_v51  ;;  %242 = vmatpush.msra.mxu3 %v210_v57 }
  0x3c   :  { %359 = vmatpush.msrb.mxu2 %v349_v6  ;;  %280 = vmatpush.msrb.mxu0 %v258_v19 }
  0x3d   :  { %325 = vmatpush.msrb.mxu1 %v298_v53  ;;  %243 = vmatpush.msra.mxu3 %v209_v61 }
  0x3e   :  { %360 = vmatpush.msrb.mxu2 %v348_v8  ;;  %281 = vmatpush.msrb.mxu0 %v257_v21 }
  0x3f   :  { %326 = vmatpush.msrb.mxu1 %v297_v55  ;;  %244 = vmatpush.msra.mxu3 %v208_v0 }
  0x40   :  { %361 = vmatpush.msrb.mxu2 %v347_v10  ;;  %282 = vmatpush.msrb.mxu0 %v256_v23 }
  0x41   :  { %327 = vmatpush.msrb.mxu1 %v296_v58 }
  0x42   :  { %362 = vmatpush.msrb.mxu2 %v346_v12  ;;  %283 = vmatpush.msrb.mxu0 %v255_v31 }
  0x43   :  { %328 = vmatpush.msrb.mxu1 %v295_v62 }
  0x44   :  { %363 = vmatpush.msrb.mxu2 %v345_v14  ;;  %284 = vmatpush.msrb.mxu0 %v254_v33 }
  0x45   :  { %329 = vmatpush.msrb.mxu1 %v294_v1 }
  0x46   :  { %364 = vmatpush.msrb.mxu2 %v344_v16  ;;  %285 = vmatpush.msrb.mxu0 %v253_v39 }
  0x48   :  { %365 = vmatpush.msrb.mxu2 %v343_v18  ;;  %286 = vmatpush.msrb.mxu0 %v252_v40 }
  0x4a   :  { %366 = vmatpush.msrb.mxu2 %v342_v20  ;;  %287 = vmatpush.msrb.mxu0 %v251_v41 }
  0x4c   :  { %367 = vmatpush.msrb.mxu2 %v341_v22 }
  0x4e   :  { %368 = vmatpush.msrb.mxu2 %v340_v24 }
  0x50   :  { %369 = vmatpush.msrb.mxu2 %v339_v25 }
  0x52   :  { %370 = vmatpush.msrb.mxu2 %v338_v30 }
  0x54   :  { %371 = vmatpush.msrb.mxu2 %v337_v32 }
  0x56   :  { %372 = vmatpush.msrb.mxu2 %v336_v34 }
  0x9b   :  { %v138_v45 = vpop.f32.mrf.mxu0 }
  0x9c   :  { %v139_v46 = vadd.f32 %v138_v45, %v113_v44 }
  0x9e   :  { %v161_v47 = vmax.f32 %v139_v46, 0.0  ;;  %v403_v46 = vld [vmem:[#allocation9 + $0x1] ss:$0 sm:$0xff] }
  0xa0   :  { %202 = vmatmul.f32.vlgmr.msra.gmra.mxu2 %v161_v47 }
  0xa3   :  { %v158_v59 = vpop.f32.mrf.mxu1 }
  0xa4   :  { %v159_v60 = vadd.f32 %v158_v59, %v114_v56 }
  0xa6   :  { %v162_v63 = vmax.f32 %v159_v60, 0.0 }
  0xa8   :  { %330 = vmatmul.f32.vlgmr.msrb.gmra.mxu1 %v162_v63 }
 0x123   :  { %v203_v27 = vpop.f32.mrf.mxu2 }
 0x124   :  { %v204_v28 = vadd.f32 %v399_v26, %v203_v27 }
 0x125   :  { %v331_v36 = vpop.f32.mrf.mxu1 }
 0x126   :  { %v206_v29 = vmax.f32 %v204_v28, 0.0  ;;  %v332_v37 = vadd.f32 %v400_v35, %v331_v36 }
 0x128   :  { %245 = vmatmul.f32.vlgmr.msra.gmra.mxu3 %v206_v29  ;;  %v334_v38 = vmax.f32 %v332_v37, 0.0 }
 0x12a   :  { %373 = vmatmul.f32.vlgmr.msrb.gmra.mxu2 %v334_v38 }
 0x1ab   :  { %v246_v43 = vpop.f32.mrf.mxu3 }
 0x1ac   :  { %v247_v44 = vadd.f32 %v401_v42, %v246_v43 }
 0x1ad   :  { %v374_v47 = vpop.f32.mrf.mxu2 }
 0x1ae   :  { %v249_v45 = vmax.f32 %v247_v44, 0.0  ;;  %v375_v48 = vadd.f32 %v403_v46, %v374_v47 }
 0x1b0   :  { %288 = vmatmul.f32.vlgmr.msrb.gmra.mxu0 %v249_v45  ;;  %377 = vst [vmem:[%s625_s7 + $0x8] sm:$0xff] %v375_v48 }
 0x22d   :  { %v289_v50 = vpop.f32.mrf.mxu0 }
 0x22e   :  { %v290_v51 = vadd.f32 %v402_v49, %v289_v50 }
 0x230   :  { %292 = vst [vmem:[%s625_s7] sm:$0xff] %v290_v51 }
 0x231   :  { %382 = vsyncpa [#allocation3], 1 }
 0x232   :  { %383 = vsyncpa [#allocation5], 1 }
 0x233   :  { %384 = vsyncpa [#allocation8], 1 }

</bundles_post_ra>
